<compile_context>
chip_gen: v7x
topology: tpu7x:2x2x1
jax: 0.10.0
libtpu: 0.0.40
codegen_flags: <defaults>
</compile_context>

<pallas_src>
import functools

import jax
import jax.numpy as jnp
from jax.experimental import pallas as pl
from jax.experimental.pallas import tpu as pltpu


def _round_up(x, m):
    return ((x + m - 1) // m) * m


def _value_net_kernel(x_ref, w1_ref, b1_ref, w2_ref, b2_ref, w3_ref, b3_ref,
                      o_ref):
    """Fused relu(x@W1+b1) -> relu(.@W2+b2) -> . . w3 + b3 for one batch tile."""
    x = x_ref[...]

    # Hidden matmuls on the MXU at the weights' dtype (bf16 by default) with
    # f32 accumulation; bias add + ReLU stay f32.
    h1 = jnp.dot(x.astype(w1_ref.dtype), w1_ref[...],
                 preferred_element_type=jnp.float32)
    h1 = jnp.maximum(h1 + b1_ref[...], 0.0)

    h2 = jnp.dot(h1.astype(w2_ref.dtype), w2_ref[...],
                 preferred_element_type=jnp.float32)
    h2 = jnp.maximum(h2 + b2_ref[...], 0.0)

    # Final layer (out_features == 1): VPU multiply + XLU lane reduce instead
    # of a 1-column MXU matmul.
    w3_row = w3_ref[...].astype(jnp.float32)            # (1, H)
    v = jnp.sum(h2 * w3_row, axis=-1, keepdims=True)    # (tb, 1)
    o_ref[...] = (v + b3_ref[0, 0]).astype(o_ref.dtype)


def _default_batch_tile(batch):
    # Tiny batches: a single tile (block dim == array dim is always layout-legal).
    if batch <= 256:
        return batch
    # Otherwise guarantee >= 2 grid steps (pipelining + v7x dual-TC sharding),
    # cap tiles at 1024 rows (comfortably inside v7x's 64 MiB VMEM at these
    # hidden sizes), rounded up to the f32 sublane count (8).
    return min(1024, _round_up(pl.cdiv(batch, 2), 8))


@functools.partial(jax.jit, static_argnames=("batch_tile", "compute_dtype"))
def value_network_forward(state, w1, b1, w2, b2, w3, b3, *, batch_tile=None,
                          compute_dtype=jnp.bfloat16):
    """Fused ValueNetwork forward pass.

    state: [B, num_inputs] f32
    w1: [num_inputs, H], b1: [1, H], w2: [H, H], b2: [1, H],
    w3: [H, 1],          b3: [1, 1]
    returns: [B, 1] f32
    """
    B, num_inputs = state.shape
    hidden = w1.shape[1]

    # Pad hidden to a multiple of 128 lanes (zero padding is exact, see header).
    hp = _round_up(hidden, 128)
    ph = hp - hidden
    w1p = jnp.pad(w1, ((0, 0), (0, ph))).astype(compute_dtype)
    b1p = jnp.pad(b1, ((0, 0), (0, ph))).astype(jnp.float32)
    w2p = jnp.pad(w2, ((0, ph), (0, ph))).astype(compute_dtype)
    b2p = jnp.pad(b2, ((0, 0), (0, ph))).astype(jnp.float32)
    # Final layer as a (1, hp) row for the VPU/XLU path.
    w3p = jnp.pad(w3.reshape(1, hidden), ((0, 0), (0, ph))).astype(jnp.float32)
    b3p = b3.reshape(1, 1).astype(jnp.float32)

    tb = _default_batch_tile(B) if batch_tile is None else batch_tile
    grid = (pl.cdiv(B, tb),)

    in_specs = [
        pl.BlockSpec((tb, num_inputs), lambda i: (i, 0)),    # streamed x tile
        pl.BlockSpec((num_inputs, hp), lambda i: (0, 0)),    # W1 (resident)
        pl.BlockSpec((1, hp), lambda i: (0, 0)),             # b1
        pl.BlockSpec((hp, hp), lambda i: (0, 0)),            # W2 (resident)
        pl.BlockSpec((1, hp), lambda i: (0, 0)),             # b2
        pl.BlockSpec((1, hp), lambda i: (0, 0)),             # w3 as a row
        pl.BlockSpec(memory_space=pltpu.MemorySpace.SMEM),   # b3 scalar
    ]
    out_spec = pl.BlockSpec((tb, 1), lambda i: (i, 0))

    itemsize = state.dtype.itemsize
    flops = 2 * B * (num_inputs * hp + hp * hp + hp)
    bytes_accessed = (
        B * num_inputs * itemsize                       # streamed x
        + w1p.size * w1p.dtype.itemsize                 # weights (read once)
        + w2p.size * w2p.dtype.itemsize
        + (b1p.size + b2p.size + w3p.size + 1) * 4
        + B * 4                                         # output column
    )

    return pl.pallas_call(
        _value_net_kernel,
        out_shape=jax.ShapeDtypeStruct((B, 1), jnp.float32),
        grid_spec=pltpu.PrefetchScalarGridSpec(
            num_scalar_prefetch=0,
            grid=grid,
            in_specs=in_specs,
            out_specs=out_spec,
        ),
        compiler_params=pltpu.CompilerParams(
            dimension_semantics=("parallel",),
            # Explicit cap above the 16/32 MiB scoped defaults, below v7x's
            # 64 MiB physical VMEM.  Actual usage at tb=1024, H=256 is ~5 MiB.
            vmem_limit_bytes=48 * 1024 * 1024,
        ),
        cost_estimate=pl.CostEstimate(
            flops=flops, transcendentals=0, bytes_accessed=bytes_accessed),
    )(state, w1p, b1p, w2p, b2p, w3p, b3p)


def xavier_uniform(key, fan_in, fan_out, gain=1.0, dtype=jnp.float32):
    """Matches torch.nn.init.xavier_uniform_ (gain=1)."""
    limit = gain * jnp.sqrt(6.0 / (fan_in + fan_out))
    # Shape [fan_in, fan_out] so the kernel can do x @ W directly.
    return jax.random.uniform(key, (fan_in, fan_out), dtype,
                              minval=-limit, maxval=limit)


def init_value_network_params(key, num_inputs, hidden_dim):
    k1, k2, k3 = jax.random.split(key, 3)
    w1 = xavier_uniform(k1, num_inputs, hidden_dim)
    b1 = jnp.zeros((1, hidden_dim), jnp.float32)
    w2 = xavier_uniform(k2, hidden_dim, hidden_dim)
    b2 = jnp.zeros((1, hidden_dim), jnp.float32)
    w3 = xavier_uniform(k3, hidden_dim, 1)
    b3 = jnp.zeros((1, 1), jnp.float32)
    return w1, b1, w2, b2, w3, b3


def value_network_ref(state, w1, b1, w2, b2, w3, b3,
                      compute_dtype=jnp.float32):
    """Pure-JAX reference of the PyTorch forward pass (optionally bf16 matmuls)."""
    cd = compute_dtype
    x = jnp.maximum(jnp.dot(state.astype(cd), w1.astype(cd),
                            preferred_element_type=jnp.float32) + b1, 0.0)
    x = jnp.maximum(jnp.dot(x.astype(cd), w2.astype(cd),
                            preferred_element_type=jnp.float32) + b2, 0.0)
    return jnp.dot(x, w3, preferred_element_type=jnp.float32) + b3


if __name__ == "__main__":
    key = jax.random.PRNGKey(0)
    k_params, k_state, k_state_big = jax.random.split(key, 3)

    # Small shapes consistent with the module.
    batch, num_inputs, hidden_dim = 2, 16, 32
    params = init_value_network_params(k_params, num_inputs, hidden_dim)
    state = jax.random.normal(k_state, (batch, num_inputs), jnp.float32)

    # f32 compute path vs. f32 reference (tight tolerance).
    ref_f32 = value_network_ref(state, *params, compute_dtype=jnp.float32)
    out_f32 = value_network_forward(state, *params, compute_dtype=jnp.float32)
    jax.block_until_ready(out_f32)
    assert out_f32.shape == (batch, 1)
    assert jnp.allclose(out_f32, ref_f32, atol=1e-5, rtol=1e-5), "f32 mismatch"

    # Default bf16-matmul path vs. a reference using the same bf16 casts.
    ref_bf16 = value_network_ref(state, *params, compute_dtype=jnp.bfloat16)
    out_bf16 = value_network_forward(state, *params)
    jax.block_until_ready(out_bf16)
    assert jnp.allclose(out_bf16, ref_bf16, atol=1e-3, rtol=1e-3), "bf16 mismatch"
    assert jnp.allclose(out_bf16, ref_f32, atol=5e-2, rtol=5e-2), "bf16 drift"

    # Larger ragged batch: exercises grid > 1 (pipelining / dual-TC path) and
    # a partial last tile whose out-of-range writes must be dropped.
    big_b = 600
    state_big = jax.random.normal(k_state_big, (big_b, num_inputs), jnp.float32)
    ref_big = value_network_ref(state_big, *params, compute_dtype=jnp.float32)
    out_big = value_network_forward(state_big, *params,
                                    compute_dtype=jnp.float32)
    jax.block_until_ready(out_big)
    assert out_big.shape == (big_b, 1)
    assert jnp.allclose(out_big, ref_big, atol=1e-5, rtol=1e-5), "ragged mismatch"

    print("KERNEL_OK")
</pallas_src>

<mosaic_0001>
module attributes {stable_mosaic.version = 11 : i64} {
  func.func @_value_net_kernel(%arg0: i32, %arg1: memref<2x16xf32, #tpu.memory_space<vmem>>, %arg2: memref<16x128xf32, #tpu.memory_space<vmem>>, %arg3: memref<1x128xf32, #tpu.memory_space<vmem>>, %arg4: memref<128x128xf32, #tpu.memory_space<vmem>>, %arg5: memref<1x128xf32, #tpu.memory_space<vmem>>, %arg6: memref<1x128xf32, #tpu.memory_space<vmem>>, %arg7: memref<1x1xf32, #tpu.memory_space<smem>>, %arg8: memref<2x1xf32, #tpu.memory_space<vmem>>) attributes {dimension_semantics = [#tpu.dimension_semantics<parallel>], iteration_bounds = array<i64: 1>, scalar_prefetch = 0 : i64, scratch_operands = 0 : i64, tpu.core_type = #tpu.core_type<tc>, window_params = [{transform_indices = @transform_0, window_bounds = array<i64: 2, 16>}, {pipeline_mode = #tpu.pipeline_mode<synchronous>, transform_indices = @transform_1, window_bounds = array<i64: 16, 128>}, {pipeline_mode = #tpu.pipeline_mode<synchronous>, transform_indices = @transform_2, window_bounds = array<i64: 1, 128>}, {pipeline_mode = #tpu.pipeline_mode<synchronous>, transform_indices = @transform_3, window_bounds = array<i64: 128, 128>}, {pipeline_mode = #tpu.pipeline_mode<synchronous>, transform_indices = @transform_4, window_bounds = array<i64: 1, 128>}, {pipeline_mode = #tpu.pipeline_mode<synchronous>, transform_indices = @transform_5, window_bounds = array<i64: 1, 128>}, {transform_indices = @transform_6, window_bounds = array<i64: 1, 1>}, {transform_indices = @transform_7, window_bounds = array<i64: 2, 1>}]} {
    %c0 = arith.constant 0 : index
    %c0_0 = arith.constant 0 : index
    %0 = vector.load %arg1[%c0, %c0_0] : memref<2x16xf32, #tpu.memory_space<vmem>>, vector<2x16xf32>
    %c0_1 = arith.constant 0 : index
    %c0_2 = arith.constant 0 : index
    %1 = vector.load %arg2[%c0_1, %c0_2] : memref<16x128xf32, #tpu.memory_space<vmem>>, vector<16x128xf32>
    %cst = arith.constant dense<0.000000e+00> : vector<2x128xf32>
    %2 = tpu.matmul %0, %1, %cst {dimension_numbers = #tpu.dot_dimension_numbers<[1], [0], [0], [1], [0, 0, 1, 1], [], []>} : vector<2x16xf32>, vector<16x128xf32>, vector<2x128xf32> -> vector<2x128xf32>
    %c0_3 = arith.constant 0 : index
    %c0_4 = arith.constant 0 : index
    %3 = vector.load %arg3[%c0_3, %c0_4] : memref<1x128xf32, #tpu.memory_space<vmem>>, vector<1x128xf32>
    %4 = vector.broadcast %3 : vector<1x128xf32> to vector<2x128xf32>
    %5 = arith.addf %2, %4 : vector<2x128xf32>
    %cst_5 = arith.constant 0.000000e+00 : f32
    %6 = vector.broadcast %cst_5 : f32 to vector<2x128xf32>
    %7 = arith.maximumf %5, %6 : vector<2x128xf32>
    %c0_6 = arith.constant 0 : index
    %c0_7 = arith.constant 0 : index
    %8 = vector.load %arg4[%c0_6, %c0_7] : memref<128x128xf32, #tpu.memory_space<vmem>>, vector<128x128xf32>
    %cst_8 = arith.constant dense<0.000000e+00> : vector<2x128xf32>
    %9 = tpu.matmul %7, %8, %cst_8 {dimension_numbers = #tpu.dot_dimension_numbers<[1], [0], [0], [1], [0, 0, 1, 1], [], []>} : vector<2x128xf32>, vector<128x128xf32>, vector<2x128xf32> -> vector<2x128xf32>
    %c0_9 = arith.constant 0 : index
    %c0_10 = arith.constant 0 : index
    %10 = vector.load %arg5[%c0_9, %c0_10] : memref<1x128xf32, #tpu.memory_space<vmem>>, vector<1x128xf32>
    %11 = vector.broadcast %10 : vector<1x128xf32> to vector<2x128xf32>
    %12 = arith.addf %9, %11 : vector<2x128xf32>
    %cst_11 = arith.constant 0.000000e+00 : f32
    %13 = vector.broadcast %cst_11 : f32 to vector<2x128xf32>
    %14 = arith.maximumf %12, %13 : vector<2x128xf32>
    %c0_12 = arith.constant 0 : index
    %c0_13 = arith.constant 0 : index
    %15 = vector.load %arg6[%c0_12, %c0_13] : memref<1x128xf32, #tpu.memory_space<vmem>>, vector<1x128xf32>
    %16 = vector.broadcast %15 : vector<1x128xf32> to vector<2x128xf32>
    %17 = arith.mulf %14, %16 : vector<2x128xf32>
    %cst_14 = arith.constant dense<0.000000e+00> : vector<2xf32>
    %18 = vector.multi_reduction <add>, %17, %cst_14 [1] : vector<2x128xf32> to vector<2xf32>
    %19 = vector.shape_cast %18 : vector<2xf32> to vector<2x1xf32>
    %c0_15 = arith.constant 0 : index
    %c0_16 = arith.constant 0 : index
    %20 = memref.load %arg7[%c0_15, %c0_16] : memref<1x1xf32, #tpu.memory_space<smem>>
    %21 = vector.broadcast %20 : f32 to vector<2x1xf32>
    %22 = arith.addf %19, %21 : vector<2x1xf32>
    %c0_17 = arith.constant 0 : index
    %c0_18 = arith.constant 0 : index
    %23 = vector.load %arg8[%c0_17, %c0_18] : memref<2x1xf32, #tpu.memory_space<vmem>>, vector<2x1xf32>
    tpu.vector_store %arg8[%c0_17, %c0_18], %22 {strides = array<i32>} : memref<2x1xf32, #tpu.memory_space<vmem>>, vector<2x1xf32>,
    return
  }
  func.func @transform_0(%arg0: i32) -> (i32, i32) {
    %c0_i32 = arith.constant 0 : i32
    %c0_i32_0 = arith.constant 0 : i32
    return %arg0, %c0_i32 : i32, i32
  }
  func.func @transform_1(%arg0: i32) -> (i32, i32) {
    %c0_i32 = arith.constant 0 : i32
    %c0_i32_0 = arith.constant 0 : i32
    %c0_i32_1 = arith.constant 0 : i32
    return %c0_i32, %c0_i32_0 : i32, i32
  }
  func.func @transform_2(%arg0: i32) -> (i32, i32) {
    %c0_i32 = arith.constant 0 : i32
    %c0_i32_0 = arith.constant 0 : i32
    %c0_i32_1 = arith.constant 0 : i32
    return %c0_i32, %c0_i32_0 : i32, i32
  }
  func.func @transform_3(%arg0: i32) -> (i32, i32) {
    %c0_i32 = arith.constant 0 : i32
    %c0_i32_0 = arith.constant 0 : i32
    %c0_i32_1 = arith.constant 0 : i32
    return %c0_i32, %c0_i32_0 : i32, i32
  }
  func.func @transform_4(%arg0: i32) -> (i32, i32) {
    %c0_i32 = arith.constant 0 : i32
    %c0_i32_0 = arith.constant 0 : i32
    %c0_i32_1 = arith.constant 0 : i32
    return %c0_i32, %c0_i32_0 : i32, i32
  }
  func.func @transform_5(%arg0: i32) -> (i32, i32) {
    %c0_i32 = arith.constant 0 : i32
    %c0_i32_0 = arith.constant 0 : i32
    %c0_i32_1 = arith.constant 0 : i32
    return %c0_i32, %c0_i32_0 : i32, i32
  }
  func.func @transform_6(%arg0: i32) -> (i32, i32) {
    %c0_i32 = arith.constant 0 : i32
    %c0_i32_0 = arith.constant 0 : i32
    %c0_i32_1 = arith.constant 0 : i32
    return %c0_i32, %c0_i32_0 : i32, i32
  }
  func.func @transform_7(%arg0: i32) -> (i32, i32) {
    %c0_i32 = arith.constant 0 : i32
    %c0_i32_0 = arith.constant 0 : i32
    return %arg0, %c0_i32 : i32, i32
  }
}

</mosaic_0001>

<bundles_post_ra>
// kernel: value_network_forward.1
= control target key start
LH: loop header
LB: loop body
LE: loop exit
PB: predicated region body
PF: predicated region fallthrough
CT: control target
= control target key end

     0   :  { %v323_v0 = vmov 0.0|0.0   ;;  %vm324_vm0 = vmmov 0   ;;  %v325_v3 = vmov 0.0   ;;  %vm37_vm1 = vcmask 130048   ;;  %s438_s1 = inlined_call_operand.vmem [shape: f32[16,128], index: 1, kind: input, shape index: {}]   ;;  %s439_s3 = inlined_call_operand.vmem [shape: f32[128,128], index: 3, kind: input, shape index: {}]   ;;  %s440_s0 = inlined_call_operand.vmem [shape: f32[2,16], index: 0, kind: input, shape index: {}]   ;;  %s441_s2 = inlined_call_operand.vmem [shape: f32[1,128], index: 2, kind: input, shape index: {}]   ;;  %s442_s4 = inlined_call_operand.vmem [shape: f32[1,128], index: 4, kind: input, shape index: {}]   ;;  %s443_s5 = inlined_call_operand.vmem [shape: f32[1,128], index: 5, kind: input, shape index: {}]   ;;  %s444_s6 = inlined_call_operand.<no memory space> [shape: f32[1,1], index: 6, kind: input, shape index: {}]   ;;  %s445_s7 = inlined_call_operand.vmem [shape: f32[2,1], index: 7, kind: output, shape index: {}]  }
   0x1   :  { %293 = vmatprep.subr.bf16.mxu0 %v323_v0  ;;  %v28_v1 = vld [vmem:[%s438_s1] sm:$0xff]  ;;  %v29_v2 = vld [vmem:[%s438_s1 + $0x8] sm:$0xff]  ;;  %255 = vmatprep.mubr.msk.f32.mxu0 %vm324_vm0, %v325_v3  ;;  %v114_v7 = vld [vmem:[%s439_s3 + $0x10] sm:$0xff]  ;;  %vm214_vm2 = vcmask 1041408   ;;  %v219_v43 = vstv %s444_s6  ;;  %vm221_vm3 = vcmask 1024  }
   0x2   :  { %v294_v4 = vpack.c.bf16 %v29_v2, %v28_v1  ;;  %296 = vmatprep.subr.bf16.mxu1 %v323_v0  ;;  %v112_v5 = vld [vmem:[%s439_s3] sm:$0xff]  ;;  %v113_v6 = vld [vmem:[%s439_s3 + $0x8] sm:$0xff]  ;;  %290 = vmatprep.mubr.msk.f32.mxu1 %vm324_vm0, %v325_v3  ;;  %v115_v9 = vld [vmem:[%s439_s3 + $0x18] sm:$0xff] }
   0x3   :  { %v297_v8 = vpack.c.bf16 %v113_v6, %v112_v5  ;;  %v27_v10 = vld [vmem:[%s440_s0] sm:$0x3]  ;;  %v300_v11 = vpack.c.bf16 %v115_v9, %v114_v7  ;;  %v117_v13 = vld [vmem:[%s439_s3 + $0x28] sm:$0xff]  ;;  %v118_v15 = vld [vmem:[%s439_s3 + $0x30] sm:$0xff] }
   0x4   :  { %295 = vmatpush3.bf16.msra.mxu0 %v294_v4  ;;  %v116_v12 = vld [vmem:[%s439_s3 + $0x20] sm:$0xff]  ;;  %v119_v16 = vld [vmem:[%s439_s3 + $0x38] sm:$0xff]  ;;  %v121_v19 = vld [vmem:[%s439_s3 + $0x48] sm:$0xff] }
   0x5   :  { %298 = vmatpush3.bf16.msra.mxu1 %v297_v8  ;;  %v303_v14 = vpack.c.bf16 %v117_v13, %v116_v12  ;;  %v306_v17 = vpack.c.bf16 %v119_v16, %v118_v15  ;;  %v120_v18 = vld [vmem:[%s439_s3 + $0x40] sm:$0xff]  ;;  %v122_v21 = vld [vmem:[%s439_s3 + $0x50] sm:$0xff]  ;;  %v123_v22 = vld [vmem:[%s439_s3 + $0x58] sm:$0xff] }
   0x6   :  { %299 = vmatprep.subr.bf16.mxu1 %v323_v0  ;;  %v309_v20 = vpack.c.bf16 %v121_v19, %v120_v18  ;;  %v312_v23 = vpack.c.bf16 %v123_v22, %v122_v21  ;;  %v124_v24 = vld [vmem:[%s439_s3 + $0x60] sm:$0xff]  ;;  %v125_v25 = vld [vmem:[%s439_s3 + $0x68] sm:$0xff]  ;;  %v126_v27 = vld [vmem:[%s439_s3 + $0x70] sm:$0xff] }
   0x7   :  { %256 = vmatmul.mubr.msk.f32.vlgmr.msra.gmra.mrb[0].mxu0 %vm37_vm1, %v27_v10  ;;  %v315_v26 = vpack.c.bf16 %v125_v25, %v124_v24  ;;  %v127_v28 = vld [vmem:[%s439_s3 + $0x78] sm:$0xff]  ;;  %v227_v30 = vld [vmem:[%s441_s2] ss:$0 sm:$0xff] }
   0x8   :  { %v318_v29 = vpack.c.bf16 %v127_v28, %v126_v27  ;;  %v229_v35 = vld [vmem:[%s442_s4] ss:$0 sm:$0xff] }
   0x9   :  { %301 = vmatpush3.bf16.msra.mxu1 %v300_v11  ;;  %v230_v39 = vld [vmem:[%s443_s5] ss:$0 sm:$0xff] }
   0xa   :  { %302 = vmatprep.subr.bf16.mxu1 %v323_v0 }
   0xd   :  { %304 = vmatpush3.bf16.msra.mxu1 %v303_v14 }
   0xe   :  { %305 = vmatprep.subr.bf16.mxu1 %v323_v0 }
  0x11   :  { %307 = vmatpush3.bf16.msra.mxu1 %v306_v17 }
  0x12   :  { %308 = vmatprep.subr.bf16.mxu1 %v323_v0 }
  0x15   :  { %310 = vmatpush3.bf16.msra.mxu1 %v309_v20 }
  0x16   :  { %311 = vmatprep.subr.bf16.mxu1 %v323_v0 }
  0x19   :  { %313 = vmatpush3.bf16.msra.mxu1 %v312_v23 }
  0x1a   :  { %314 = vmatprep.subr.bf16.mxu1 %v323_v0 }
  0x1d   :  { %316 = vmatpush3.bf16.msra.mxu1 %v315_v26 }
  0x1e   :  { %317 = vmatprep.subr.bf16.mxu1 %v323_v0 }
  0x21   :  { %319 = vmatpush3.bf16.msra.mxu1 %v318_v29 }
  0xda   :  { %v107_v31 = vpop.f32.mrb[0].mxu0 }
  0xdb   :  { %v108_v32 = vadd.f32 %v227_v30, %v107_v31  ;;  %v257_v33 = vpop.f32.mrb[1].mxu0 }
  0xdd   :  { %v111_v34 = vmax.f32 %v108_v32, 0.0 }
  0xdf   :  { %291 = vmatmul.mubr.f32.vlgmr.msra.gmra.mrb[0].mxu1 %v111_v34 }
 0x1b2   :  { %v201_v36 = vpop.f32.mrb[0].mxu1 }
 0x1b3   :  { %v202_v37 = vadd.f32 %v229_v35, %v201_v36  ;;  %v292_v38 = vpop.f32.mrb[1].mxu1 }
 0x1b5   :  { %v205_v40 = vmax.f32 %v202_v37, 0.0 }
 0x1b7   :  { %v213_v41 = vmul.f32 %v230_v39, %v205_v40 }
 0x1b9   :  { %v215_v42 = vsel %vm214_vm2, %v213_v41, 0.0 }
 0x1ba   :  { %216 = vadd.xlane.f32.xlu0 %v215_v42 }
 0x247   :  { %v217_v44 = vpop.xlane.xlu0 %216 }
 0x248   :  { %v220_v45 = vadd.f32 %v219_v43, %v217_v44 }
 0x24a   :  { %222 = vst.msk [vmem:[%s445_s7] sm:$0x3] %vm221_vm3, %v220_v45 }

</bundles_post_ra>
